<compile_context>
chip_gen: v5e
topology: v5e:2x2
jax: 0.10.0
libtpu: 0.0.40
codegen_flags: <defaults>
</compile_context>

<pallas_src>
import jax
import jax.numpy as jnp
from jax.experimental import pallas as pl
from jax.experimental.pallas import tpu as pltpu


def _make_sse_kernel(bn):
    def kernel(x_ref, w_ref, b_ref, o_ref):
        # x_ref/o_ref: (Bn, C, T) activation tile, input dtype
        # w_ref:       (1, C) conv weight cast to the activation dtype (resident)
        # b_ref:       (1,)   f32 conv bias in SMEM
        w = w_ref[...]                                   # (1, C)
        bias = b_ref[0]
        for i in range(bn):                              # static, small unroll (<= 8)
            xi = x_ref[i]                                # (C, T), input dtype
            # 1x1 conv C->1 == per-pixel channel reduction: one MXU pass,
            # f32 accumulate (DEFAULT precision, no multi-pass emulation).
            s = jnp.dot(w, xi, preferred_element_type=jnp.float32) + bias  # (1, T)
            gate = jax.nn.sigmoid(s)                     # (1, T) f32 only
            # Broadcast multiply in the input dtype (no C*T f32 intermediate).
            o_ref[i] = xi * gate.astype(xi.dtype)
    return kernel


def _default_vmem_limit():
    """Chip-aware scoped-VMEM limit: ~48 MiB on v7x (64 MiB/TC), 96 MiB on v5e/v6e."""
    try:
        cap = int(pltpu.get_tpu_info().vmem_capacity_bytes)
    except Exception:
        cap = 64 * 1024 * 1024                           # conservative fallback
    return min(max(cap - 16 * 1024 * 1024, 32 * 1024 * 1024), 96 * 1024 * 1024)


def _choose_tiles(N, C, HW, itemsize, vmem_limit_bytes, *,
                  target_step_bytes=2 * 1024 * 1024,
                  max_lane_tile=8192, max_batch_block=8):
    """Pick (Bn, t_hw): batch-block and lane-tile sizes.

    Targets ~1 MiB per direction per grid step (amortizes the ~0.35 us step
    overhead) while keeping 2x-in + 2x-out double buffers well under the VMEM
    limit. No exact-divisor requirement: boundary blocks are ragged and Pallas
    masks their stores (safe: no lane-wise reduction in the kernel).
    """
    tile_budget = max(64 * 1024, vmem_limit_bytes // 8)  # per-buffer cap, large headroom
    row_bytes = C * itemsize                             # one lane column across channels

    lane_cap = max(128, tile_budget // row_bytes)
    if HW <= min(lane_cap, max_lane_tile):
        t_hw = HW                                        # whole spatial extent in one tile
    else:
        t_hw = min(HW, max_lane_tile, lane_cap)
        t_hw = max(128, (t_hw // 128) * 128)             # lane-dense tiles; last block ragged

    Bn = 1
    if t_hw == HW:                                       # small-HW stage: fold batch
        step_bytes = row_bytes * t_hw
        want = max(1, (target_step_bytes // 2) // max(1, step_bytes))
        cap = max(1, tile_budget // max(1, step_bytes))
        Bn = int(min(N, max_batch_block, want, cap))

    # Keep >= 2 grid steps so both v7x TensorCores get work.
    steps = pl.cdiv(N, Bn) * pl.cdiv(HW, t_hw)
    if steps < 2:
        if N >= 2:
            Bn = (N + 1) // 2
        elif HW >= 256:
            half = ((HW + 1) // 2 + 127) // 128 * 128
            if half < HW:
                t_hw = half
    return Bn, t_hw


def sse_forward(x_nchw, weight, bias, *, max_lane_tile=8192,
                target_step_bytes=2 * 1024 * 1024, vmem_limit_bytes=None):
    """x_nchw: (N, C, H, W); weight: (C,) 1x1-conv weight; bias: (1,) conv bias."""
    N, C, H, W = x_nchw.shape
    HW = H * W
    dtype = x_nchw.dtype
    itemsize = jnp.dtype(dtype).itemsize
    if vmem_limit_bytes is None:
        vmem_limit_bytes = _default_vmem_limit()

    Bn, t_hw = _choose_tiles(N, C, HW, itemsize, vmem_limit_bytes,
                             target_step_bytes=target_step_bytes,
                             max_lane_tile=max_lane_tile)
    grid = (pl.cdiv(N, Bn), pl.cdiv(HW, t_hw))           # both axes parallel

    x_flat = x_nchw.reshape(N, C, HW)                    # free reshape, no pad / copy
    w_row = weight.reshape(1, C).astype(dtype)           # bf16 operands on bf16 inputs
    b_vec = jnp.asarray(bias, jnp.float32).reshape(1)

    out_flat = pl.pallas_call(
        _make_sse_kernel(Bn),
        out_shape=jax.ShapeDtypeStruct((N, C, HW), dtype),
        grid=grid,
        in_specs=[
            pl.BlockSpec((Bn, C, t_hw), lambda nb, t: (nb, 0, t)),   # activation tile
            pl.BlockSpec((1, C), lambda nb, t: (0, 0)),              # weight (resident)
            pl.BlockSpec(memory_space=pltpu.MemorySpace.SMEM),       # bias scalar
        ],
        out_specs=pl.BlockSpec((Bn, C, t_hw), lambda nb, t: (nb, 0, t)),
        compiler_params=pltpu.CompilerParams(
            dimension_semantics=("parallel", "parallel"),
            vmem_limit_bytes=int(vmem_limit_bytes)),
    )(x_flat, w_row, b_vec)

    return out_flat.reshape(N, C, H, W)


def _reference(x, w, b):
    """Pure-JAX f32 reference: sigmoid(1x1 conv C->1 + bias) * x."""
    x32 = x.astype(jnp.float32)
    s = jnp.einsum("nchw,c->nhw", x32, w.astype(jnp.float32))
    gate = jax.nn.sigmoid(s[:, None, :, :] + b.astype(jnp.float32)[0])
    return x32 * gate


if __name__ == "__main__":
    key = jax.random.PRNGKey(0)
    kx, kw, kb, kx2, kw2, kx3, kw3, kx4, kw4, kx5, kw5 = jax.random.split(key, 11)

    b = jax.random.normal(kb, (1,), dtype=jnp.float32) * 0.1

    # Case 1: small lane-aligned shape (HW = 256), f32.
    x = jax.random.normal(kx, (2, 4, 16, 16), dtype=jnp.float32)
    w = jax.random.normal(kw, (4,), dtype=jnp.float32) * 0.1
    out = sse_forward(x, w, b)
    jax.block_until_ready(out)
    assert jnp.allclose(out, _reference(x, w, b), atol=1e-2, rtol=1e-2), "case1 mismatch"

    # Case 2: HW = 196 (14x14), f32 — non-multiple-of-128 lane width, no padding.
    x2 = jax.random.normal(kx2, (2, 8, 14, 14), dtype=jnp.float32)
    w2 = jax.random.normal(kw2, (8,), dtype=jnp.float32) * 0.1
    out2 = sse_forward(x2, w2, b)
    assert jnp.allclose(out2, _reference(x2, w2, b), atol=1e-2, rtol=1e-2), "case2 mismatch"

    # Case 3: 56x56 (HW = 3136) + bf16 I/O.
    x3 = jax.random.normal(kx3, (2, 32, 56, 56), dtype=jnp.float32).astype(jnp.bfloat16)
    w3 = jax.random.normal(kw3, (32,), dtype=jnp.float32) * 0.1
    out3 = sse_forward(x3, w3, b)
    assert out3.dtype == jnp.bfloat16, "case3 dtype mismatch"
    assert jnp.allclose(out3.astype(jnp.float32), _reference(x3, w3, b),
                        atol=3e-2, rtol=3e-2), "case3 mismatch"

    # Case 4: batch-folded small-HW stage (N=7, 14x14, bf16) — exercises Bn>1
    # plus a ragged boundary batch block.
    x4 = jax.random.normal(kx4, (7, 16, 14, 14), dtype=jnp.float32).astype(jnp.bfloat16)
    w4 = jax.random.normal(kw4, (16,), dtype=jnp.float32) * 0.1
    out4 = sse_forward(x4, w4, b)
    assert jnp.allclose(out4.astype(jnp.float32), _reference(x4, w4, b),
                        atol=3e-2, rtol=3e-2), "case4 mismatch"

    # Case 5: forced ragged spatial tiling (28x28 with max_lane_tile=512), f32.
    x5 = jax.random.normal(kx5, (2, 16, 28, 28), dtype=jnp.float32)
    w5 = jax.random.normal(kw5, (16,), dtype=jnp.float32) * 0.1
    out5 = sse_forward(x5, w5, b, max_lane_tile=512)
    assert jnp.allclose(out5, _reference(x5, w5, b), atol=1e-2, rtol=1e-2), "case5 mismatch"

    jax.block_until_ready((out, out2, out3, out4, out5))
    print("KERNEL_OK")
</pallas_src>

<mosaic_0001>
module attributes {stable_mosaic.version = 11 : i64} {
  func.func @kernel(%arg0: i32, %arg1: i32, %arg2: memref<1x4x256xf32, #tpu.memory_space<vmem>>, %arg3: memref<1x4xf32, #tpu.memory_space<vmem>>, %arg4: memref<1xf32, #tpu.memory_space<smem>>, %arg5: memref<1x4x256xf32, #tpu.memory_space<vmem>>) attributes {dimension_semantics = [#tpu.dimension_semantics<parallel>, #tpu.dimension_semantics<parallel>], iteration_bounds = array<i64: 2, 1>, scalar_prefetch = 0 : i64, scratch_operands = 0 : i64, tpu.core_type = #tpu.core_type<tc>, window_params = [{transform_indices = @transform_0, window_bounds = array<i64: 1, 4, 256>}, {pipeline_mode = #tpu.pipeline_mode<synchronous>, transform_indices = @transform_1, window_bounds = array<i64: 1, 4>}, {transform_indices = @transform_2, window_bounds = array<i64: 1>}, {transform_indices = @transform_3, window_bounds = array<i64: 1, 4, 256>}]} {
    %c0 = arith.constant 0 : index
    %c0_0 = arith.constant 0 : index
    %0 = vector.load %arg3[%c0, %c0_0] : memref<1x4xf32, #tpu.memory_space<vmem>>, vector<1x4xf32>
    %c0_1 = arith.constant 0 : index
    %1 = memref.load %arg4[%c0_1] : memref<1xf32, #tpu.memory_space<smem>>
    %c0_2 = arith.constant 0 : index
    %c0_3 = arith.constant 0 : index
    %c0_4 = arith.constant 0 : index
    %2 = vector.load %arg2[%c0_2, %c0_3, %c0_4] : memref<1x4x256xf32, #tpu.memory_space<vmem>>, vector<1x4x256xf32>
    %3 = vector.shape_cast %2 : vector<1x4x256xf32> to vector<4x256xf32>
    %cst = arith.constant dense<0.000000e+00> : vector<1x256xf32>
    %4 = tpu.matmul %0, %3, %cst {dimension_numbers = #tpu.dot_dimension_numbers<[1], [0], [0], [1], [0, 0, 1, 1], [], []>} : vector<1x4xf32>, vector<4x256xf32>, vector<1x256xf32> -> vector<1x256xf32>
    %5 = vector.broadcast %1 : f32 to vector<1x256xf32>
    %6 = arith.addf %4, %5 : vector<1x256xf32>
    %7 = arith.negf %6 : vector<1x256xf32>
    %8 = math.exp %7 : vector<1x256xf32>
    %cst_5 = arith.constant 1.000000e+00 : f32
    %9 = vector.broadcast %cst_5 : f32 to vector<1x256xf32>
    %10 = arith.addf %9, %8 : vector<1x256xf32>
    %11 = arith.divf %9, %10 : vector<1x256xf32>
    %12 = vector.broadcast %11 : vector<1x256xf32> to vector<4x256xf32>
    %13 = arith.mulf %3, %12 : vector<4x256xf32>
    %c0_6 = arith.constant 0 : index
    %c0_7 = arith.constant 0 : index
    %c0_8 = arith.constant 0 : index
    %14 = vector.load %arg5[%c0_6, %c0_7, %c0_8] : memref<1x4x256xf32, #tpu.memory_space<vmem>>, vector<1x4x256xf32>
    %15 = vector.shape_cast %14 : vector<1x4x256xf32> to vector<4x256xf32>
    %16 = vector.shape_cast %13 : vector<4x256xf32> to vector<1x4x256xf32>
    tpu.vector_store %arg5[%c0_6, %c0_7, %c0_8], %16 {strides = array<i32>} : memref<1x4x256xf32, #tpu.memory_space<vmem>>, vector<1x4x256xf32>,
    return
  }
  func.func @transform_0(%arg0: i32, %arg1: i32) -> (i32, i32, i32) {
    %c0_i32 = arith.constant 0 : i32
    %c0_i32_0 = arith.constant 0 : i32
    return %arg0, %c0_i32, %arg1 : i32, i32, i32
  }
  func.func @transform_1(%arg0: i32, %arg1: i32) -> (i32, i32) {
    %c0_i32 = arith.constant 0 : i32
    %c0_i32_0 = arith.constant 0 : i32
    %c0_i32_1 = arith.constant 0 : i32
    return %c0_i32, %c0_i32_0 : i32, i32
  }
  func.func @transform_2(%arg0: i32, %arg1: i32) -> i32 {
    %c0_i32 = arith.constant 0 : i32
    %c0_i32_0 = arith.constant 0 : i32
    return %c0_i32 : i32
  }
  func.func @transform_3(%arg0: i32, %arg1: i32) -> (i32, i32, i32) {
    %c0_i32 = arith.constant 0 : i32
    %c0_i32_0 = arith.constant 0 : i32
    return %arg0, %c0_i32, %arg1 : i32, i32, i32
  }
}

</mosaic_0001>

<bundles_post_ra>
// kernel: tpu_custom_call.1
= control target key start
LH: loop header
LB: loop body
LE: loop exit
PB: predicated region body
PF: predicated region fallthrough
CT: control target
= control target key end

     0   :  { %s781_s0 = inlined_call_operand.hbm [shape: f32[2,4,256], index: 0, kind: input, shape index: {}]   ;;  %s782_s1 = inlined_call_operand.vmem [shape: f32[1,4], index: 1, kind: input, shape index: {}]   ;;  %s783_s2 = inlined_call_operand.<no memory space> [shape: f32[1], index: 2, kind: input, shape index: {}]   ;;  %s784_s3 = inlined_call_operand.hbm [shape: f32[2,4,256], index: 3, kind: output, shape index: {}]  }
   0x1   :  { %8 = sst [smem:[#allocation2]] %s783_s2 }
   0x2   :  { %9 = vsyncpa [#allocation4], 0 }
   0x3   :  { %11 = vsyncpa [#allocation4 + $0x1], 0 }
   0x4   :  { %12 = vsyncpa [#allocation5], 0 }
   0x5   :  { %14 = vsyncpa [#allocation5 + $0x1], 0  ;;  %s647_s14 = smov 0   ;;  %s649_s15 = smov 0  }
   0x6   :  { %s651_s16 = smov 0   ;;  %s653_s17 = smov 0  }
   0x7   :  { %s655_s18 = smov 0   ;;  %s657_s19 = smov 0  }
   0x8 LB: > { %s417_s2 = sadd.s32 4294967295, %s622_s19   ;;  %s418_s20 = sadd.s32 4294967294, %s622_s19   ;;  %s622_s19 = sphi %s657_s19, %s20_s19   ;;  %s618_s18 = sphi %s655_s18, %s793_s18   ;;  %s614_s17 = sphi %s653_s17, %s792_s17   ;;  %s610_s16 = sphi %s651_s16, %s791_s16   ;;  %s606_s15 = sphi %s649_s15, %s790_s15   ;;  %s602_s14 = sphi %s647_s14, %s789_s14  }
   0x9   : > { %s32_s21 = sadd.s32 1, %s618_s18  ;;  %s41_s22 = sadd.s32 1, %s610_s16 }
   0xa   : > { %p34_p0 = scmp.ge.s32.totalorder %s32_s21, 2  ;;  %p48_p1 = scmp.ne.s32.totalorder %s610_s16, %s606_s15 }
   0xb   : > { %p49_p2 = scmp.eq.s32.totalorder %s622_s19, 0  ;;  %p54_p3 = scmp.ne.s32.totalorder %s606_s15, %s602_s14 }
   0xc   : > { %s795_s21 = smov (%p34_p0, %s32_s21), 0  ;;  %p55_p5 = scmp.eq.s32.totalorder %s417_s2, 0 }
   0xd   : > { %p688_p4 = por %p49_p2, %p48_p1  ;;  %s36_s24 = ssub.s32 %s618_s18, %s795_s21 }
   0xe   : > { %p122_p6 = scmp.eq.s32.totalorder %s417_s2, 1  ;;  %p39_p7 = scmp.eq.s32.totalorder %s36_s24, 0 }
   0xf   : > { %p694_p8 = por %p55_p5, %p54_p3  ;;  %p128_p10 = scmp.eq.s32.totalorder %s418_s20, 1 }
  0x10   : > { %p698_p9 = por %p122_p6, %p48_p1  ;;  %p420_p12 = scmp.ge.s32.totalorder %s622_s19, 2 }
  0x11   : > { %s703_s27 = scalar_select %p39_p7, %s610_s16, %s41_s22  }
  0x12   : > { %p705_p11 = por %p128_p10, %p54_p3  ;;  %p452_p13 = scmp.lt.s32.totalorder %s622_s19, 2 }
  0x13   : > { %s154_s29 = sand.u32 1, %s610_s16   ;;  %s438_s4 = sshll.u32 %s618_s18, 3 }
  0x14   : > { %s421_s30 = sshll.u32 %s154_s29, 3  ;;  %s165_s7 = scalar_lea.hbm %s781_s0, %s438_s4 }
  0x15   : > { %s158_s8 = scalar_lea.vmem [#allocation3], %s421_s30  ;;  %s167_s10 = sshll.u32 %s165_s7, 4  ;;  %s168_s10 = int_to_ptr.hbm [resolvable:$true] %s167_s10 }
  0x16   : > { %s169_s9 = sshll.u32 %s158_s8, 4  ;;  %p445_p0 = pnand %p452_p13, %p688_p4  ;;  %s170_s9 = int_to_ptr.vmem [resolvable:$true] %s169_s9 }
  0x17   : > { %p424_p1 = scmp.ge.s32.totalorder %s622_s19, 1  ;;  %p174_p2 = scmp.lt.s32.totalorder %s622_s19, 3 }
  0x18   : > { %s155_s11 = scalar_lea.sflag [#allocation4], %s154_s29 }
  0x19   : > { %447 = dma.hbm_to_vmem [thread:$0]  (!%p445_p0), %s168_s10, 128, %s170_s9, %s155_s11  }
  0x1a   : > { %p175_p3 = pnand %p424_p1, %p174_p2 }
  0x1b   : > { %s721_s12 = sand.u32 (!%p175_p3), 1, %s606_s15  }
  0x1c   : > { %178 = sbr.rel (%p175_p3) target bundleno = 211 (0xd3), region = 32  ;;  %s425_s13 = sshll.u32 (!%p175_p3), %s721_s12, 3 }
  0x1d   : > { %s181_s2 = scalar_lea.sflag (!%p175_p3), [#allocation4], %s721_s12  ;;  %s184_s20 = scalar_lea.vmem (!%p175_p3), [#allocation3], %s425_s13 }
  0x21   : > { %593 = dma.done.wait (%p694_p8), %s181_s2, 128  }
  0x22   : > { %595 = vsyncadd (%p694_p8), %s181_s2, 4294967168  ;;  %v731_v0 = vld [vmem:[%s184_s20] sm:$0xff]  ;;  %vm222_vm0 = vcmask 1043456   ;;  %v210_v1 = vld [vmem:[%s782_s1] sm:$0x1]  ;;  %vm218_vm1 = vcmask 31744  }
  0x23   : > { %215 = vst [vmem:[#allocation1] ss:$2 sm:$0xff] %v731_v0  ;;  %s211_s24 = sld [smem:[#allocation2]]  ;;  %s439_s25 = sshll.u32 %s614_s17, 3 }
  0x24   : > { %s328_s4 = scalar_lea.hbm %s784_s3, %s439_s25  ;;  %s207_s17 = scalar_lea.vmem [#allocation6], %s425_s13 }
  0x25   : > { %s330_s5 = sshll.u32 %s207_s17, 4  ;;  %s332_s6 = sshll.u32 %s328_s4, 4  ;;  %s331_s5 = int_to_ptr.vmem [resolvable:$true] %s330_s5  ;;  %s333_s6 = int_to_ptr.hbm [resolvable:$true] %s332_s6 }
  0x26   : > { %s315_s7 = scalar_lea.sflag [#allocation5], %s721_s12  ;;  %s554_s8 = sshra.s32 %s333_s6, 4  ;;  %s555_s8 = int_to_ptr.hbm [resolvable:$true] %s554_s8 }
  0x27   : > { %s556_s9 = scalar_lea.hbm %s555_s8, 8  ;;  %s560_s13 = scalar_lea.hbm %s784_s3, 16 }
  0x28   : > { %p557_p4 = scmp.ne.s32.totalorder %s555_s8, %s556_s9  ;;  %p561_p7 = scmp.lt.s32.totalorder %s555_s8, %s784_s3 }
  0x29   : > { %v213_v4 = vstv %s211_s24  ;;  %p562_p8 = scmp.lt.s32.totalorder %s560_s13, %s556_s9 }
  0x2a   : > { %v216_v2 = vld.sshfl [vmem:[#allocation1] sm:$0xff pattern:$0x75316420]  ;;  %v217_v3 = vld.sshfl [vmem:[#allocation1 + $0x8] sm:$0xff pattern:$0x75316420]  ;;  %p558_p5 = pnand %p557_p4, %p698_p9 }
  0x2b   : > { %427 = vmatpush.msk.msra.mxu0 %vm222_vm0, %v216_v2  ;;  %429 = vmatpush.msk.msra.mxu1 %vm222_vm0, %v217_v3  ;;  %p563_p10 = por %p562_p8, %p561_p7 }
  0x2c   : > { %428 = vmatmul.msk.f32.vlgmr.msra.gmra.mxu0 %vm218_vm1, %v210_v1  ;;  %430 = vmatmul.msk.f32.vlgmr.msra.gmra.mxu1 %vm218_vm1, %v210_v1  ;;  %p559_p6 = pneg %p558_p5 }
  0x2e   : > { %p564_p13 = pnand %p563_p10, %p559_p6 }
  0xa9   : > { %v244_v5 = vpop.f32.mrf.mxu0  ;;  %v264_v6 = vpop.f32.mrf.mxu1 }
  0xaa   : > { %v245_v7 = vadd.f32 %v244_v5, %v213_v4  ;;  %v265_v8 = vadd.f32 %v264_v6, %v213_v4 }
  0xac   : > { %v431_v9 = vmul.f32 -1.442695, %v245_v7  ;;  %v432_v10 = vmul.f32 -1.442695, %v265_v8 }
  0xae   : > { %502 = vpow2.f32 %v431_v9 }
  0xaf   : > { %504 = vpow2.f32 %v432_v10 }
  0xb4   : > { %v503_v11 = vpop.eup %502 }
  0xb5   : > { %v505_v12 = vpop.eup %504  ;;  %v273_v13 = vadd.f32 1.0, %v503_v11 }
  0xb6   : > { %v274_v14 = vadd.f32 1.0, %v505_v12 }
  0xb7   : > { %506 = vrcp.f32 %v273_v13  ;;  %v286_v22 = vand.u32 2147483648, %v273_v13  ;;  %v284_v24 = vand.u32 2147483647, %v273_v13  ;;  %vm280_vm4 = vweird.f32 %v273_v13 }
  0xb8   : > { %508 = vrcp.f32 %v274_v14  ;;  %v301_v23 = vand.u32 2147483648, %v274_v14  ;;  %v299_v26 = vand.u32 2147483647, %v274_v14  ;;  %vm295_vm6 = vweird.f32 %v274_v14 }
  0xb9   : > { %v287_v29 = vor.u32 1.1754944e-38, %v286_v22  ;;  %vm285_vm8 = vcmp.eq.f32.partialorder %v284_v24, 8.507059e+37 }
  0xba   : > { %v302_v30 = vor.u32 1.1754944e-38, %v301_v23  ;;  %vm300_vm9 = vcmp.eq.f32.partialorder %v299_v26, 8.507059e+37 }
  0xbd   : > { %v507_v15 = vpop.eup %506 }
  0xbe   : > { %v509_v16 = vpop.eup %508  ;;  %v276_v17 = vmul.f32 %v507_v15, %v273_v13  ;;  %vm281_vm2 = vweird.f32 %v507_v15 }
  0xbf   : > { %v291_v18 = vmul.f32 %v509_v16, %v274_v14  ;;  %vm296_vm3 = vweird.f32 %v509_v16  ;;  %vm282_vm5 = vmor %vm280_vm4, %vm281_vm2 }
  0xc0   : > { %v277_v19 = vsub.f32 1.0, %v276_v17  ;;  %vm297_vm7 = vmor %vm295_vm6, %vm296_vm3 }
  0xc1   : > { %v292_v20 = vsub.f32 1.0, %v291_v18 }
  0xc2   : > { %v278_v21 = vmul.f32 %v507_v15, %v277_v19 }
  0xc3   : > { %v293_v25 = vmul.f32 %v509_v16, %v292_v20 }
  0xc4   : > { %v279_v27 = vadd.f32 %v507_v15, %v278_v21 }
  0xc5   : > { %v294_v28 = vadd.f32 %v509_v16, %v293_v25 }
  0xc6   : > { %v283_v31 = vsel %vm282_vm5, %v507_v15, %v279_v27 }
  0xc7   : > { %v298_v32 = vsel %vm297_vm7, %v509_v16, %v294_v28  ;;  %v288_v33 = vsel %vm285_vm8, %v287_v29, %v283_v31 }
  0xc8   : > { %v303_v34 = vsel %vm300_vm9, %v302_v30, %v298_v32  ;;  %v305_v36 = vperm.slane %v288_v33, 0 }
  0xc9   : > { %v306_v35 = vperm.slane %v303_v34, 0 }
  0xcb   : > { %v309_v37 = vrot.slane %v306_v35, 4 }
  0xcd   : > { %v310_v38 = vsel %vm222_vm0, %v305_v36, %v309_v37 }
  0xce   : > { %v312_v39 = vmul.f32 %v310_v38, %v731_v0 }
  0xd0   : > { %313 = vst [vmem:[%s207_s17] sm:$0xff] %v312_v39 }
  0xd1   : > { %567 = shalt.err (!%p564_p13)
}
  0xd2   : > { %442 = dma.vmem_to_hbm [thread:$0]  (%p698_p9), %s331_s5, 128, %s333_s6, %s315_s7  }
  0xd3 PF: > { %s344_s12 = sand.u32 1, %s602_s14   ;;  %p449_p0 = pnand %p420_p12, %p705_p11 }
  0xd4   : > { %s345_s22 = scalar_lea.sflag [#allocation5], %s344_s12 }
  0xd5   : > { %p450_p1 = pneg %p449_p0 }
  0xd7   : > { %597 = dma.done.wait (%p450_p1), %s345_s22, 128  }
  0xd8   : > { %599 = vsyncadd (%p450_p1), %s345_s22, 4294967168  ;;  %s20_s19 = sadd.s32 1, %s622_s19   ;;  %s789_s14 = smov %s606_s15 }
  0xd9   : > { %p17_p2 = scmp.ge.s32.totalorder %s20_s19, 4   ;;  %s790_s15 = smov %s610_s16 }
  0xda   : > { %s791_s16 = smov %s703_s27  ;;  %s792_s17 = smov %s618_s18 }
  0xdb   : > { %s793_s18 = smov %s795_s21  ;;  %19 = sbr.rel (!%p17_p2) target bundleno = 8 (0x8), region = 77 }
  0xe0   :  { %351 = vsyncpa [#allocation4], 1 }
  0xe1   :  { %353 = vsyncpa [#allocation4 + $0x1], 1 }
  0xe2   :  { %354 = vsyncpa [#allocation5], 1 }
  0xe3   :  { %356 = vsyncpa [#allocation5 + $0x1], 1 }

</bundles_post_ra>
